<compile_context>
chip_gen: v7x
topology: tpu7x:2x2x1
jax: 0.10.0
libtpu: 0.0.40
codegen_flags: <defaults>
</compile_context>

<pallas_src>
import functools
import math

import jax
import jax.numpy as jnp
from jax import lax
from jax.experimental import pallas as pl
from jax.experimental.pallas import tpu as pltpu


# Above the 32 MiB scoped default, below v7x's 64 MiB physical VMEM.
_VMEM_LIMIT_BYTES = 48 * 1024 * 1024


# ----------------------------------------------------------------------------
# Fused projection kernel: out[s] = x @ w[s] + b[s]   (bf16 MXU, f32 accumulate)
# ----------------------------------------------------------------------------

def _proj_kernel(x_ref, w_ref, b_ref, o_ref):
    # x: (tm, K), w: (K, tn) bf16, b: (1, tn) f32 -> o: (tm, tn)
    x = x_ref[...].astype(w_ref.dtype)                       # bf16 for the MXU
    acc = jnp.dot(x, w_ref[...], preferred_element_type=jnp.float32)
    o_ref[...] = (acc + b_ref[...]).astype(o_ref.dtype)


def pallas_fused_proj(x2d, w, b, out_dtype, *, tm=256, tn=512):
    """x2d: (M, K); w: (n_slots, K, N) bf16; b: (n_slots, 1, N) f32 -> (n_slots, M, N).

    Grid = (slot, N-tile, M-tile).  The weight block depends only on (slot, n),
    so it stays resident across the whole M sweep (no re-DMA); M is the
    'parallel' axis for DMA pipelining / megacore sharding.  Tiling N keeps the
    resident weight block (K, tn) instead of the full (K, N) matrix (v7x VMEM).
    """
    M, K = x2d.shape
    n_slots, _, N = w.shape
    tm = min(tm, M)
    tn = min(tn, N)
    grid = (n_slots, pl.cdiv(N, tn), pl.cdiv(M, tm))
    return pl.pallas_call(
        _proj_kernel,
        out_shape=jax.ShapeDtypeStruct((n_slots, M, N), out_dtype),
        grid=grid,
        in_specs=[
            pl.BlockSpec((tm, K), lambda s, n, m: (m, 0)),
            pl.BlockSpec((None, K, tn), lambda s, n, m: (s, 0, n)),
            pl.BlockSpec((None, 1, tn), lambda s, n, m: (s, 0, n)),
        ],
        out_specs=pl.BlockSpec((None, tm, tn), lambda s, n, m: (s, m, n)),
        compiler_params=pltpu.CompilerParams(
            dimension_semantics=("arbitrary", "arbitrary", "parallel"),
            vmem_limit_bytes=_VMEM_LIMIT_BYTES),
    )(x2d, w, b)


# ----------------------------------------------------------------------------
# Flash attention kernel (online softmax, KV-tiled, heads looped over lanes)
# ----------------------------------------------------------------------------

def _flash_attn_kernel(q_ref, k_ref, v_ref, o_ref, m_sc, l_sc, acc_sc, *,
                       num_heads, head_dim):
    # q_ref: (tq, E), k_ref / v_ref: (tk, E), o_ref: (tq, E) with E = H * D.
    kv = pl.program_id(2)

    @pl.when(kv == 0)
    def _():
        m_sc[...] = jnp.full_like(m_sc, -jnp.inf)
        l_sc[...] = jnp.zeros_like(l_sc)
        acc_sc[...] = jnp.zeros_like(acc_sc)

    q_all = q_ref[...]     # (tq, E) bf16; 1/sqrt(D) already folded into W_q
    k_all = k_ref[...]     # (tk, E) bf16
    v_all = v_ref[...]     # (tk, E) bf16

    for h in range(num_heads):                 # static loop; heads live in lanes
        lo = h * head_dim
        hi = lo + head_dim
        q = q_all[:, lo:hi]                    # (tq, D)
        k = k_all[:, lo:hi]                    # (tk, D)
        v = v_all[:, lo:hi]                    # (tk, D)

        # q @ k^T without a transposed copy of k: contract the last dims.
        s = lax.dot_general(q, k, (((1,), (1,)), ((), ())),
                            preferred_element_type=jnp.float32)   # (tq, tk) f32

        m_prev = m_sc[h]
        m_new = jnp.maximum(m_prev, jnp.max(s, axis=-1, keepdims=True))
        alpha = jnp.exp(m_prev - m_new)
        p = jnp.exp(s - m_new)
        l_sc[h] = alpha * l_sc[h] + jnp.sum(p, axis=-1, keepdims=True)
        acc_sc[h] = alpha * acc_sc[h] + jnp.dot(
            p.astype(v.dtype), v, preferred_element_type=jnp.float32)
        m_sc[h] = m_new

    @pl.when(kv == pl.num_programs(2) - 1)
    def _():
        outs = []
        for h in range(num_heads):
            inv_l = pl.reciprocal(l_sc[h], approx=True)        # EUP slot, ~free
            outs.append((acc_sc[h] * inv_l).astype(o_ref.dtype))
        # One lane-dense (tq, H*D) store -> unmasked vst.
        o_ref[...] = jnp.concatenate(outs, axis=-1)


def pallas_flash_mha(qkv, num_heads, *, tq=256, tk=256):
    """qkv: (3, B, S, E) -> (B, S, E); non-causal softmax(q k^T / sqrt(D)) v.

    Grid = (B, S//tq, S//tk); the KV axis is innermost and "arbitrary" so the
    output block stays resident and the f32 scratch accumulators implement
    online softmax.  Heads are kept in the lane dim (E = H*D) and looped inside
    the kernel, so q/k/v/o blocks are lane-dense and no head-split transpose is
    ever materialized in HBM.  tq/tk default 256 (fills the 256x256 MXU on
    v6e/v7x, 128-aligned for v5e); raise further on v5e/v6e if VMEM allows.
    """
    _, B, S, E = qkv.shape
    assert E % num_heads == 0
    D = E // num_heads
    tq = min(tq, S)
    tk = min(tk, S)
    assert S % tq == 0 and S % tk == 0, "seq len must divide the q/kv tile size"

    grid = (B, S // tq, S // tk)
    q_spec = pl.BlockSpec((None, None, tq, E), lambda b, qi, ki: (0, b, qi, 0))
    k_spec = pl.BlockSpec((None, None, tk, E), lambda b, qi, ki: (1, b, ki, 0))
    v_spec = pl.BlockSpec((None, None, tk, E), lambda b, qi, ki: (2, b, ki, 0))
    o_spec = pl.BlockSpec((None, tq, E), lambda b, qi, ki: (b, qi, 0))

    kernel = functools.partial(_flash_attn_kernel, num_heads=num_heads, head_dim=D)
    return pl.pallas_call(
        kernel,
        out_shape=jax.ShapeDtypeStruct((B, S, E), qkv.dtype),
        grid_spec=pltpu.PrefetchScalarGridSpec(
            num_scalar_prefetch=0,
            grid=grid,
            in_specs=[q_spec, k_spec, v_spec],
            out_specs=o_spec,
            scratch_shapes=[
                pltpu.VMEM((num_heads, tq, 1), jnp.float32),   # m: running row max
                pltpu.VMEM((num_heads, tq, 1), jnp.float32),   # l: running denom
                pltpu.VMEM((num_heads, tq, D), jnp.float32),   # acc: unnormalized out
            ]),
        compiler_params=pltpu.CompilerParams(
            dimension_semantics=("parallel", "parallel", "arbitrary"),
            vmem_limit_bytes=_VMEM_LIMIT_BYTES),
    )(qkv, qkv, qkv)


# ----------------------------------------------------------------------------
# FlashAttention forward (glue in plain JAX is only free reshapes)
# ----------------------------------------------------------------------------

def prepare_params(raw, num_heads):
    """One-time weight prep (outside the forward): stack Q/K/V into a (3, E, E)
    bf16 weight, fold 1/sqrt(head_dim) into the Q slot, keep biases in f32."""
    E = raw["wq"].shape[0]
    head_dim = E // num_heads
    scale = 1.0 / math.sqrt(head_dim)
    w_qkv = jnp.stack([raw["wq"] * scale, raw["wk"], raw["wv"]]).astype(jnp.bfloat16)
    b_qkv = jnp.stack([raw["bq"] * scale, raw["bk"], raw["bv"]]
                      ).reshape(3, 1, E).astype(jnp.float32)
    w_proj = raw["wp"][None].astype(jnp.bfloat16)
    b_proj = raw["bp"].reshape(1, 1, E).astype(jnp.float32)
    return {"w_qkv": w_qkv, "b_qkv": b_qkv, "w_proj": w_proj, "b_proj": b_proj}


def flash_attention_forward(x, params, num_heads):
    """x: (B, S, E) f32 -> (B, S, E) f32 (shape_len==3 path of the module)."""
    B, S, E = x.shape
    x2d = x.reshape(B * S, E)

    # Fused QKV projection straight into the (3, B, S, E) layout the attention
    # kernel indexes — no q/k/v slices or head transposes in the wrapper.
    qkv = pallas_fused_proj(x2d, params["w_qkv"], params["b_qkv"], jnp.bfloat16)
    qkv = qkv.reshape(3, B, S, E)                                  # free reshape

    ctx = pallas_flash_mha(qkv, num_heads)                         # (B, S, E) bf16

    out = pallas_fused_proj(ctx.reshape(B * S, E),
                            params["w_proj"], params["b_proj"], x.dtype)
    return out.reshape(B, S, E)


def reference_forward(x, raw, num_heads):
    B, S, E = x.shape
    H = num_heads
    D = E // H
    q = x @ raw["wq"] + raw["bq"]
    k = x @ raw["wk"] + raw["bk"]
    v = x @ raw["wv"] + raw["bv"]
    q = q.reshape(B, S, H, D).transpose(0, 2, 1, 3)
    k = k.reshape(B, S, H, D).transpose(0, 2, 1, 3)
    v = v.reshape(B, S, H, D).transpose(0, 2, 1, 3)
    s = jnp.einsum("bhqd,bhkd->bhqk", q, k) / jnp.sqrt(jnp.float32(D))
    p = jax.nn.softmax(s, axis=-1)
    ctx = jnp.einsum("bhqk,bhkd->bhqd", p, v)
    ctx = ctx.transpose(0, 2, 1, 3).reshape(B, S, E)
    return ctx @ raw["wp"] + raw["bp"]


# ----------------------------------------------------------------------------
# Main
# ----------------------------------------------------------------------------

if __name__ == "__main__":
    B, S, E, H = 2, 8, 32, 4

    key = jax.random.PRNGKey(0)
    keys = jax.random.split(key, 9)
    wscale = 0.02
    raw_params = {
        "wq": jax.random.normal(keys[0], (E, E), jnp.float32) * wscale,
        "bq": jax.random.normal(keys[1], (E,), jnp.float32) * wscale,
        "wk": jax.random.normal(keys[2], (E, E), jnp.float32) * wscale,
        "bk": jax.random.normal(keys[3], (E,), jnp.float32) * wscale,
        "wv": jax.random.normal(keys[4], (E, E), jnp.float32) * wscale,
        "bv": jax.random.normal(keys[5], (E,), jnp.float32) * wscale,
        "wp": jax.random.normal(keys[6], (E, E), jnp.float32) * wscale,
        "bp": jax.random.normal(keys[7], (E,), jnp.float32) * wscale,
    }
    x = jax.random.normal(keys[8], (B, S, E), jnp.float32)

    params = prepare_params(raw_params, H)             # one-time fusion / bf16 cast

    out = flash_attention_forward(x, params, H)
    out = jax.block_until_ready(out)

    ref = reference_forward(x, raw_params, H)
    assert out.shape == (B, S, E)
    # Tolerance reflects bf16 MXU operands (f32 accumulation / softmax state).
    assert jnp.allclose(out, ref, atol=1e-3, rtol=2e-2), float(
        jnp.max(jnp.abs(out - ref)))

    print("KERNEL_OK")
</pallas_src>

<mosaic_0001>
module attributes {stable_mosaic.version = 11 : i64} {
  func.func @_proj_kernel(%arg0: i32, %arg1: i32, %arg2: i32, %arg3: memref<16x32xf32, #tpu.memory_space<vmem>>, %arg4: memref<1x32x32xbf16, #tpu.memory_space<vmem>>, %arg5: memref<1x1x32xf32, #tpu.memory_space<vmem>>, %arg6: memref<1x16x32xbf16, #tpu.memory_space<vmem>>) attributes {dimension_semantics = [#tpu.dimension_semantics<arbitrary>, #tpu.dimension_semantics<arbitrary>, #tpu.dimension_semantics<parallel>], iteration_bounds = array<i64: 3, 1, 1>, scalar_prefetch = 0 : i64, scratch_operands = 0 : i64, tpu.core_type = #tpu.core_type<tc>, window_params = [{transform_indices = @transform_0, window_bounds = array<i64: 16, 32>}, {transform_indices = @transform_1, window_bounds = array<i64: 1, 32, 32>}, {transform_indices = @transform_2, window_bounds = array<i64: 1, 1, 32>}, {transform_indices = @transform_3, window_bounds = array<i64: 1, 16, 32>}]} {
    %c0 = arith.constant 0 : index
    %c0_0 = arith.constant 0 : index
    %0 = vector.load %arg3[%c0, %c0_0] : memref<16x32xf32, #tpu.memory_space<vmem>>, vector<16x32xf32>
    %1 = arith.truncf %0 : vector<16x32xf32> to vector<16x32xbf16>
    %c0_1 = arith.constant 0 : index
    %c0_2 = arith.constant 0 : index
    %c0_3 = arith.constant 0 : index
    %2 = vector.load %arg4[%c0_1, %c0_2, %c0_3] : memref<1x32x32xbf16, #tpu.memory_space<vmem>>, vector<1x32x32xbf16>
    %3 = vector.shape_cast %2 : vector<1x32x32xbf16> to vector<32x32xbf16>
    %cst = arith.constant dense<0.000000e+00> : vector<16x32xf32>
    %4 = tpu.matmul %1, %3, %cst {dimension_numbers = #tpu.dot_dimension_numbers<[1], [0], [0], [1], [0, 0, 1, 1], [], []>} : vector<16x32xbf16>, vector<32x32xbf16>, vector<16x32xf32> -> vector<16x32xf32>
    %c0_4 = arith.constant 0 : index
    %c0_5 = arith.constant 0 : index
    %c0_6 = arith.constant 0 : index
    %5 = vector.load %arg5[%c0_4, %c0_5, %c0_6] : memref<1x1x32xf32, #tpu.memory_space<vmem>>, vector<1x1x32xf32>
    %6 = vector.shape_cast %5 : vector<1x1x32xf32> to vector<1x32xf32>
    %7 = vector.broadcast %6 : vector<1x32xf32> to vector<16x32xf32>
    %8 = arith.addf %4, %7 : vector<16x32xf32>
    %9 = arith.truncf %8 : vector<16x32xf32> to vector<16x32xbf16>
    %c0_7 = arith.constant 0 : index
    %c0_8 = arith.constant 0 : index
    %c0_9 = arith.constant 0 : index
    %10 = vector.load %arg6[%c0_7, %c0_8, %c0_9] : memref<1x16x32xbf16, #tpu.memory_space<vmem>>, vector<1x16x32xbf16>
    %11 = vector.shape_cast %10 : vector<1x16x32xbf16> to vector<16x32xbf16>
    %12 = vector.shape_cast %9 : vector<16x32xbf16> to vector<1x16x32xbf16>
    tpu.vector_store %arg6[%c0_7, %c0_8, %c0_9], %12 {strides = array<i32>} : memref<1x16x32xbf16, #tpu.memory_space<vmem>>, vector<1x16x32xbf16>,
    return
  }
  func.func @transform_0(%arg0: i32, %arg1: i32, %arg2: i32) -> (i32, i32) {
    %c0_i32 = arith.constant 0 : i32
    %c0_i32_0 = arith.constant 0 : i32
    return %arg2, %c0_i32 : i32, i32
  }
  func.func @transform_1(%arg0: i32, %arg1: i32, %arg2: i32) -> (i32, i32, i32) {
    %c0_i32 = arith.constant 0 : i32
    %c0_i32_0 = arith.constant 0 : i32
    return %arg0, %c0_i32, %arg1 : i32, i32, i32
  }
  func.func @transform_2(%arg0: i32, %arg1: i32, %arg2: i32) -> (i32, i32, i32) {
    %c0_i32 = arith.constant 0 : i32
    %c0_i32_0 = arith.constant 0 : i32
    return %arg0, %c0_i32, %arg1 : i32, i32, i32
  }
  func.func @transform_3(%arg0: i32, %arg1: i32, %arg2: i32) -> (i32, i32, i32) {
    %c0_i32 = arith.constant 0 : i32
    return %arg0, %arg2, %arg1 : i32, i32, i32
  }
}

</mosaic_0001>

<bundles_post_ra>
// kernel: tpu_custom_call.1
= control target key start
LH: loop header
LB: loop body
LE: loop exit
PB: predicated region body
PF: predicated region fallthrough
CT: control target
= control target key end

     0   :  { %8 = vsyncpa [#allocation3], 0  ;;  %s1002_s0 = inlined_call_operand.hbm [shape: f32[16,32], index: 0, kind: input, shape index: {}]   ;;  %s1003_s1 = inlined_call_operand.hbm [shape: bf16[3,32,32], index: 1, kind: input, shape index: {}]   ;;  %s1004_s2 = inlined_call_operand.vmem [shape: f32[3,1,32], index: 2, kind: input, shape index: {}]   ;;  %s1005_s3 = inlined_call_operand.hbm [shape: bf16[3,16,32], index: 3, kind: output, shape index: {}]  }
   0x1   :  { %9 = vsyncpa [#allocation6], 0 }
   0x2   :  { %11 = vsyncpa [#allocation6 + $0x1], 0 }
   0x3   :  { %12 = vsyncpa [#allocation4], 0 }
   0x4   :  { %14 = vsyncpa [#allocation4 + $0x1], 0  ;;  %s779_s12 = smov 0   ;;  %s781_s13 = smov 0  }
   0x5   :  { %s783_s14 = smov 0   ;;  %s785_s15 = smov 0  }
   0x6   :  { %s787_s16 = smov 0   ;;  %s789_s17 = smov 0  }
   0x7 LB: > { %s481_s18 = sadd.s32 4294967295, %s746_s17   ;;  %s482_s19 = sadd.s32 4294967294, %s746_s17   ;;  %s746_s17 = sphi %s789_s17, %s20_s17   ;;  %s742_s16 = sphi %s787_s16, %s1028_s16   ;;  %s738_s15 = sphi %s785_s15, %s1027_s15   ;;  %s734_s14 = sphi %s783_s14, %s1026_s14   ;;  %s730_s13 = sphi %s781_s13, %s1025_s13   ;;  %s726_s12 = sphi %s779_s12, %s1024_s12  }
   0x8   : > { %p87_p0 = scmp.ne.s32.totalorder %s730_s13, %s726_s12  ;;  %p813_p1 = scmp.eq.s32.totalorder %s481_s18, 0 }
   0x9   : > { %p817_p2 = scmp.eq.s32.totalorder %s481_s18, 2  ;;  %p149_p3 = scmp.eq.s32.totalorder %s482_s19, 2 }
   0xa   : > { %s1010_s20 = scalar_select %p813_p1, 1, 0 }
   0xb   : > { %s1011_s21 = scalar_select %p817_p2, 1, 0 }
   0xc   : > { %p823_p4 = por %p813_p1, %p87_p0  ;;  %p483_p5 = scmp.ge.s32.totalorder %s746_s17, 1 }
   0xd   : > { %p828_p6 = por %p149_p3, %p87_p0  ;;  %p156_p7 = scmp.lt.s32.totalorder %s746_s17, 4 }
   0xe   : > { %s1012_s22 = scalar_select %p823_p4, 1, 0 }
   0xf   : > { %s1013_s23 = scalar_select %p828_p6, 1, 0 }
  0x10   : > { %p833_p8 = pnand %p483_p5, %p156_p7  ;;  %s748_s25 = smov [#allocation2]  }
  0x11   : > { %s171_s26 = sshll.u32 %s748_s25, 4  ;;  %s39_s28 = sadd.s32 1, %s742_s16  ;;  %s172_s26 = int_to_ptr.vmem [resolvable:$true] %s171_s26 }
  0x12   : > { %s1014_s24 = scalar_select %p833_p8, 1, 0 }
  0x13   : > { %p527_p9 = pneg %p833_p8  ;;  %s602_s4 = scalar_lea.hbm %s1002_s0, 256 }
  0x14   : > { %p603_p11 = scmp.ne.s32.totalorder %s1002_s0, %s602_s4  ;;  %p609_p3 = scmp.lt.u32.totalorder %s602_s4, %s1002_s0 }
  0x15   : > { %p841_p10 = pnand %p527_p9, %p813_p1 }
  0x17   : > { %p604_p12 = pneg %p841_p10 }
  0x19   : > { %p605_p13 = pnand %p604_p12, %p603_p11 }
  0x1b   : > { %p606_p0 = pneg %p605_p13 }
  0x1d   : > { %p611_p5 = pnand %p609_p3, %p606_p0 }
  0x1f   : > { %614 = shalt.err (!%p611_p5)
}
  0x20   : > { %s615_s9 = scalar_lea.vmem %s172_s26, 256  ;;  %p623_p4 = scmp.lt.s32.totalorder %s172_s26, %s172_s26 }
  0x21   : > { %p616_p7 = scmp.ne.s32.totalorder %s172_s26, %s615_s9  ;;  %p624_p1 = scmp.lt.s32.totalorder %s615_s9, %s615_s9 }
  0x23   : > { %p618_p9 = pnand %p616_p7, %p604_p12  ;;  %p625_p8 = por %p624_p1, %p623_p4 }
  0x25   : > { %p619_p6 = pneg %p618_p9 }
  0x27   : > { %p626_p2 = pnand %p625_p8, %p619_p6 }
  0x29   : > { %629 = shalt.err (!%p626_p2)
}
  0x2a   : > { %s749_s10 = smov 128   ;;  %s750_s11 = smov 8  }
  0x2b   : > { %530 = dma.hbm_to_vmem [thread:$0]  (!%p841_p10), %s1002_s0, 256, %s172_s26, [#allocation3], %s749_s10, %s749_s10, %s750_s11  }
  0x2c   : > { %p41_p1 = scmp.ge.s32.totalorder %s39_s28, 3  ;;  %s74_s25 = sadd.s32 1, %s734_s14 }
  0x2d   : > { %p81_p2 = scmp.ne.s32.totalorder %s734_s14, %s730_s13  ;;  %p82_p4 = scmp.eq.s32.totalorder %s746_s17, 0 }
  0x2e   : > { %s1030_s28 = smov (%p41_p1, %s39_s28), 0  ;;  %p1017_p8 = scmp.ne.s32.totalorder %s1011_s21, 0 }
  0x2f   : > { %p868_p6 = por %p82_p4, %p81_p2  ;;  %s69_s27 = ssub.s32 %s742_s16, %s1030_s28 }
  0x30   : > { %p874_p11 = por %p1017_p8, %p81_p2  ;;  %p540_p12 = scmp.lt.s32.totalorder %s746_s17, 3 }
  0x31   : > { %p72_p10 = scmp.eq.s32.totalorder %s69_s27, 0  ;;  %s185_s26 = sand.u32 1, %s734_s14  }
  0x32   : > { %s486_s4 = sshll.u32 %s185_s26, 4  ;;  %s504_s6 = sshll.u32 %s742_s16, 8 }
  0x33   : > { %s883_s5 = scalar_select %p72_p10, %s734_s14, %s74_s25  }
  0x34   : > { %s889_s9 = scalar_lea.hbm %s1003_s1, %s504_s6  ;;  %s189_s21 = scalar_lea.vmem [#allocation5], %s486_s4 }
  0x35   : > { %s197_s10 = sshll.u32 %s189_s21, 4  ;;  %p895_p13 = pnand %p540_p12, %p868_p6  ;;  %s891_s10 = int_to_ptr.vmem [resolvable:$true] %s197_s10 }
  0x36   : > { %s899_s18 = scalar_lea.sflag [#allocation6], %s185_s26  ;;  %s630_s19 = scalar_lea.hbm %s889_s9, 256 }
  0x37   : > { %p631_p0 = scmp.ne.s32.totalorder %s889_s9, %s630_s19  ;;  %p632_p3 = pneg %p895_p13 }
  0x38   : > { %s635_s29 = scalar_lea.hbm %s1003_s1, 768  ;;  %p636_p9 = scmp.lt.u32.totalorder %s889_s9, %s1003_s1 }
  0x39   : > { %p633_p5 = pnand %p632_p3, %p631_p0  ;;  %p637_p1 = scmp.lt.u32.totalorder %s635_s29, %s630_s19 }
  0x3a   : > { %p639_p4 = scmp.lt.u32.totalorder %s630_s19, %s889_s9 }
  0x3b   : > { %p634_p7 = pneg %p633_p5  ;;  %p638_p2 = por %p637_p1, %p636_p9 }
  0x3d   : > { %p640_p6 = por %p639_p4, %p638_p2 }
  0x3f   : > { %p641_p8 = pnand %p640_p6, %p634_p7 }
  0x41   : > { %644 = shalt.err (!%p641_p8)
}
  0x42   : > { %s645_s26 = scalar_lea.vmem %s891_s10, 256  ;;  %s751_s7 = smov [#allocation5]  }
  0x43   : > { %p646_p12 = scmp.ne.s32.totalorder %s891_s10, %s645_s26  ;;  %s650_s8 = sshll.u32 %s751_s7, 4  ;;  %s651_s8 = int_to_ptr.vmem [resolvable:$false] %s650_s8 }
  0x44   : > { %s652_s21 = scalar_lea.vmem %s651_s8, 512  ;;  %p653_p5 = scmp.lt.s32.totalorder %s891_s10, %s651_s8 }
  0x45   : > { %p648_p10 = pnand %p646_p12, %p632_p3  ;;  %p654_p9 = scmp.lt.s32.totalorder %s652_s21, %s645_s26 }
  0x47   : > { %p649_p0 = pneg %p648_p10  ;;  %p655_p1 = por %p654_p9, %p653_p5 }
  0x49   : > { %p656_p2 = pnand %p655_p1, %p649_p0 }
  0x4b   : > { %659 = shalt.err (!%p656_p2)
}
  0x4c   : > { %s752_s19 = smov 64   ;;  %s753_s25 = smov 4  }
  0x4d   : > { %534 = dma.hbm_to_vmem [thread:$0]  (!%p895_p13), %s889_s9, 256, %s891_s10, %s899_s18, %s752_s19, %s752_s19, %s753_s25  }
  0x4e   : > { %p1020_p3 = scmp.ne.s32.totalorder %s1014_s24, 0 }
  0x4f   : > { %p1021_p7 = scmp.ne.s32.totalorder (!%p1020_p3), %s1010_s20, 0 }
  0x50   : > { %218 = sbr.rel (%p1020_p3) target bundleno = 334 (0x14e), region = 32 }
  0x57   : > { %713 = dma.done.wait (%p1021_p7), [#allocation3], 256  }
  0x58   : > { %715 = vsyncadd (%p1021_p7), [#allocation3], 4294967040  ;;  %s934_s27 = sand.u32 1, %s730_s13   ;;  %p1022_p4 = scmp.ne.s32.totalorder %s1012_s22, 0 }
  0x59   : > { %s491_s29 = sshll.u32 %s934_s27, 4  ;;  %s225_s4 = scalar_lea.sflag [#allocation6], %s934_s27 }
  0x5a   : > { %s228_s6 = scalar_lea.vmem [#allocation5], %s491_s29 }
  0x5b   : > { %717 = dma.done.wait (%p1022_p4), %s225_s4, 256  }
  0x5c   : > { %719 = vsyncadd (%p1022_p4), %s225_s4, 4294967040  ;;  %v754_v0 = vmov 0.0   ;;  %vm755_vm0 = vmmov 0   ;;  %v600_v1 = vld [vmem:[%s228_s6] sm:$0xff]   ;;  %v601_v2 = vld [vmem:[%s228_s6 + $0x8] sm:$0xff]   ;;  %vm292_vm1 = vcmask 261120  }
  0x5d   : > { %511 = vmatprep.subr.bf16.mxu0 %v754_v0  ;;  %515 = vmatprep.mubr.msk.bf16.mxu0 %vm755_vm0, %v754_v0  ;;  %v266_v3 = vld [vmem:[#allocation2] sm:$0xff]  ;;  %v267_v4 = vld [vmem:[#allocation2 + $0x8] sm:$0xff]  ;;  %p258_p13 = scmp.lt.s32.totalorder %s738_s15, 2  ;;  %s492_s22 = sshll.u32 %s934_s27, 3  ;;  %vm345_vm2 = vcmask 257024  }
  0x5e   : > { %512 = vmatpush3.bf16.msra.mxu0 %v600_v1  ;;  %v268_v5 = vpack.c.bf16 %v267_v4, %v266_v3  ;;  %s256_s11 = scalar_lea.vmem [#allocation7], %s492_s22  ;;  %s507_s26 = sshll.u32 %s738_s15, 7 }
  0x5f   : > { %513 = vmatprep.subr.bf16.mxu0 %v754_v0  ;;  %s259_s20 = scalar_select %p258_p13, %s738_s15, 2 }
  0x60   : > { %s365_s18 = sshll.u32 %s256_s11, 4  ;;  %s952_s21 = scalar_lea.hbm %s1005_s3, %s507_s26  ;;  %s954_s18 = int_to_ptr.vmem [resolvable:$true] %s365_s18 }
  0x61   : > { %s263_s10 = scalar_lea.vmem %s1004_s2, %s259_s20  ;;  %s349_s19 = scalar_lea.sflag [#allocation4], %s934_s27 }
  0x62   : > { %514 = vmatpush3.bf16.msra.mxu0 %v601_v2  ;;  %v493_v6 = vld [vmem:[%s263_s10] ss:$0 sm:$0xff]  ;;  %s660_s15 = scalar_lea.vmem %s954_s18, 128  ;;  %s756_s25 = smov [#allocation7]  }
  0x63   : > { %p661_p6 = scmp.ne.s32.totalorder %s954_s18, %s660_s15  ;;  %s664_s29 = sshll.u32 %s756_s25, 4  ;;  %s665_s29 = int_to_ptr.vmem [resolvable:$false] %s664_s29 }
  0x64   : > { %s666_s4 = scalar_lea.vmem %s665_s29, 256  ;;  %p667_p10 = scmp.lt.s32.totalorder %s954_s18, %s665_s29 }
  0x65   : > { %516 = vmatmul.mubr.msk.bf16.vlgmr.msra.gmra.mrb[0].mxu0 %vm292_vm1, %v268_v5  ;;  %p662_p8 = pnand %p661_p6, %p874_p11  ;;  %p668_p0 = scmp.lt.s32.totalorder %s666_s4, %s660_s15 }
  0x67   : > { %p663_p12 = pneg %p662_p8  ;;  %p669_p5 = por %p668_p0, %p667_p10 }
  0x69   : > { %p670_p9 = pnand %p669_p5, %p663_p12 }
 0x138   : > { %v330_v7 = vpop.f32.mrb[0].mxu0 }
 0x139   : > { %v331_v8 = vadd.f32 %v493_v6, %v330_v7  ;;  %v517_v9 = vpop.f32.mrb[1].mxu0 }
 0x13a   : > { %v333_v10 = vpop.f32.mrb[2].mxu0 }
 0x13b   : > { %v505_v11 = vpack.c.bf16 %v331_v8, %v331_v8  ;;  %v334_v12 = vadd.f32 %v493_v6, %v333_v10  ;;  %v518_v13 = vpop.f32.mrb[3].mxu0 }
 0x13d   : > { %346 = vst.msk [vmem:[%s256_s11] sm:$0xf] %vm345_vm2, %v505_v11  ;;  %v506_v14 = vpack.c.bf16 %v334_v12, %v334_v12 }
 0x13f   : > { %347 = vst.msk [vmem:[%s256_s11 + $0x4] sm:$0xf] %vm345_vm2, %v506_v14 }
 0x140   : > { %673 = shalt.err (!%p670_p9)
}
 0x141   : > { %s674_s6 = scalar_lea.hbm %s952_s21, 128  ;;  %s678_s24 = scalar_lea.hbm %s1005_s3, 384 }
 0x142   : > { %p675_p1 = scmp.ne.s32.totalorder %s952_s21, %s674_s6  ;;  %p679_p7 = scmp.lt.u32.totalorder %s952_s21, %s1005_s3 }
 0x143   : > { %p680_p4 = scmp.lt.u32.totalorder %s678_s24, %s674_s6  ;;  %p682_p6 = scmp.lt.u32.totalorder %s674_s6, %s952_s21 }
 0x144   : > { %p676_p2 = pnand %p675_p1, %p874_p11 }
 0x145   : > { %p681_p13 = por %p680_p4, %p679_p7 }
 0x146   : > { %p677_p3 = pneg %p676_p2 }
 0x147   : > { %p683_p8 = por %p682_p6, %p681_p13 }
 0x149   : > { %p684_p12 = pnand %p683_p8, %p677_p3 }
 0x14b   : > { %687 = shalt.err (!%p684_p12)
}
 0x14c   : > { %s757_s11 = smov 64   ;;  %s758_s26 = smov 4  }
 0x14d   : > { %525 = dma.vmem_to_hbm [thread:$0]  (%p874_p11), %s954_s18, 128, %s952_s21, %s349_s19, %s757_s11, %s757_s11, %s758_s26  }
 0x14e PF: > { %p542_p10 = scmp.ge.s32.totalorder %s746_s17, 2  ;;  %s380_s7 = sand.u32 1, %s726_s12  }
 0x14f   : > { %p1023_p0 = scmp.ne.s32.totalorder %s1013_s23, 0  ;;  %s381_s8 = scalar_lea.sflag [#allocation4], %s380_s7 }
 0x151   : > { %p536_p5 = pnand %p542_p10, %p1023_p0 }
 0x153   : > { %721 = dma.done.wait (!%p536_p5), %s381_s8, 128  }
 0x154   : > { %723 = vsyncadd (!%p536_p5), %s381_s8, 4294967168  ;;  %s20_s17 = sadd.s32 1, %s746_s17   ;;  %s1024_s12 = smov %s730_s13 }
 0x155   : > { %p17_p9 = scmp.ge.s32.totalorder %s20_s17, 5   ;;  %s1025_s13 = smov %s734_s14 }
 0x156   : > { %s1026_s14 = smov %s883_s5  ;;  %s1027_s15 = smov %s742_s16 }
 0x157   : > { %s1028_s16 = smov %s1030_s28  ;;  %19 = sbr.rel (!%p17_p9) target bundleno = 7 (0x7), region = 86 }
 0x15e   :  { %386 = vsyncpa [#allocation3], 1 }
 0x15f   :  { %388 = vsyncpa [#allocation3 + $0x1], 1 }
 0x160   :  { %389 = vsyncpa [#allocation6], 1 }
 0x161   :  { %391 = vsyncpa [#allocation6 + $0x1], 1 }
 0x162   :  { %392 = vsyncpa [#allocation4], 1 }
 0x163   :  { %394 = vsyncpa [#allocation4 + $0x1], 1 }

</bundles_post_ra>
